<compile_context>
chip_gen: v7x
topology: tpu7x:2x2x1
jax: 0.10.0
libtpu: 0.0.40
codegen_flags: <defaults>
</compile_context>

<pallas_src>
import functools

import jax
import jax.numpy as jnp
from jax.experimental import pallas as pl
from jax.experimental.pallas import tpu as pltpu


# --------------------------------------------------------------------------- #
# Kernel
# --------------------------------------------------------------------------- #
def _downsample_kernel(x_ref, bnd_ref, scale_ref, wm_ref, wh_ref, b_ref, o_ref,
                       *, has_halo):
    """One row tile of the folded strided conv.

    x_ref:     (bm, stride*Cin)    rows; row m = (batch b, output position p)
    bnd_ref:   (1, 1, stride*Cin)  row preceding this tile's first row
    scale_ref: (bm, 1) f32         0.0 where p == 0 (halo == conv's left zero pad)
    wm_ref:    (stride*Cin, Cout)  taps j >= k//2  (current aligned row)
    wh_ref:    (stride*Cin, Cout)  taps j <  k//2  (previous aligned row)
    b_ref:     (1, Cout) f32       bias
    o_ref:     (bm, Cout)
    """
    x = x_ref[...]
    acc = jnp.dot(x, wm_ref[...], preferred_element_type=jnp.float32)
    if has_halo:
        # Halo product for every row, then shift it down by one row so output p
        # gets the previous row's contribution.  Shift runs on the f32 product
        # (robust for bf16 inputs); the tile-boundary row comes from bnd_ref and
        # batch-start rows are zeroed by scale_ref.
        h = jnp.dot(x, wh_ref[...], preferred_element_type=jnp.float32)
        hb = jnp.dot(bnd_ref[0], wh_ref[...], preferred_element_type=jnp.float32)
        h_prev = jnp.concatenate([hb, h[:-1, :]], axis=0)   # one-sublane shift
        acc = acc + h_prev * scale_ref[...]
    o_ref[...] = (acc + b_ref[...]).astype(o_ref.dtype)


# --------------------------------------------------------------------------- #
# One-time parameter folding (hoisted out of the forward)
# --------------------------------------------------------------------------- #
def fold_conv1d_params(weight, bias, *, stride=4, dtype=jnp.float32):
    """Fold nn.Conv1d(in, out, k, stride, padding=k//2) params for the kernel.

    weight: (out_dim, in_dim, k) torch layout; bias: (out_dim,).
    Returns (w_main, w_halo, bias2d).  Call once at parameter-load time; use
    dtype=jnp.bfloat16 at production shapes (accumulation stays f32 in-kernel).
    """
    Cout, Cin, K = weight.shape
    if K > stride:
        # TODO(synk): kernel_size > stride (overlapping windows) would need a real
        # im2col path; the module default (k=3, stride=4) never hits it.
        raise NotImplementedError("kernel_size > stride not supported")
    P = K // 2
    w_t = jnp.transpose(weight, (2, 1, 0)).astype(dtype)          # (K, Cin, Cout)
    n_main = K - P                                                # taps j >= P
    w_main = jnp.concatenate(
        [w_t[P:].reshape(n_main * Cin, Cout),
         jnp.zeros(((stride - n_main) * Cin, Cout), dtype)], axis=0)
    w_halo = jnp.concatenate(
        [jnp.zeros(((stride - P) * Cin, Cout), dtype),
         w_t[:P].reshape(P * Cin, Cout)], axis=0)
    bias2d = bias.reshape(1, Cout).astype(jnp.float32)
    return w_main, w_halo, bias2d


def _choose_bm(M, block_m):
    """Biggest row tile that fits the VMEM budget, multiple of 8 (sublane) unless
    it covers the whole array, and >= 2 tiles once M is large so both v7x
    TensorCores get work (harmless on single-TC v5e/v6e)."""
    block_m = max(8, (block_m // 8) * 8)
    if M <= block_m:
        if M < 512:
            return M
        return min(M, (((M + 1) // 2) + 7) // 8 * 8)
    return block_m


# --------------------------------------------------------------------------- #
# Forward
# --------------------------------------------------------------------------- #
@functools.partial(jax.jit,
                   static_argnames=("kernel_size", "stride", "block_m", "out_dtype"))
def temporal_downsampler(x, w_main, w_halo, bias2d, *, kernel_size=3, stride=4,
                         block_m=2048, out_dtype=None):
    """TemporalDownsampler forward: (B, T, Cin) -> (B, T_out, Cout).

    w_main/w_halo/bias2d come from fold_conv1d_params (folded once at load time).
    The whole forward is under one jax.jit; when T % stride == 0 (common case)
    x reaches the kernel through a metadata-only reshape (no padded HBM copy).
    """
    B, T, Cin = x.shape
    K, S = kernel_size, stride
    P = K // 2
    KC, Cout = w_main.shape
    assert KC == S * Cin, (KC, S, Cin)

    T_out = (T + 2 * P - K) // S + 1
    L = T_out * S
    if T < L:                       # only copies when T is not a multiple of stride
        x = jnp.pad(x, ((0, 0), (0, L - T), (0, 0)))
    elif T > L:
        x = x[:, :L, :]
    M = B * T_out
    Kdim = S * Cin

    # Metadata-only reshape: row (b, p) holds x[b, p*S:(p+1)*S, :] flattened.
    x2 = x.reshape(M, Kdim).astype(w_main.dtype)

    bm = _choose_bm(M, block_m)
    num_tiles = pl.cdiv(M, bm)

    # Tiny side inputs (negligible HBM traffic):
    #  * bnd:   the row preceding each tile's first row (halo across tile edges).
    #  * scale: 0 where p == 0 within a batch (halo there is the left zero pad).
    tile_start = jnp.arange(num_tiles, dtype=jnp.int32) * bm
    bnd = x2[jnp.maximum(tile_start - 1, 0)].reshape(num_tiles, 1, Kdim)
    scale = (jnp.arange(M, dtype=jnp.int32) % T_out != 0
             ).astype(jnp.float32).reshape(M, 1)

    odt = x.dtype if out_dtype is None else out_dtype
    kernel = functools.partial(_downsample_kernel, has_halo=(P > 0))

    out2 = pl.pallas_call(
        kernel,
        out_shape=jax.ShapeDtypeStruct((M, Cout), odt),
        grid=(num_tiles,),
        in_specs=[
            pl.BlockSpec((bm, Kdim), lambda i: (i, 0)),        # x rows
            pl.BlockSpec((1, 1, Kdim), lambda i: (i, 0, 0)),   # tile boundary row
            pl.BlockSpec((bm, 1), lambda i: (i, 0)),           # halo mask
            pl.BlockSpec((Kdim, Cout), lambda i: (0, 0)),      # W_main (constant)
            pl.BlockSpec((Kdim, Cout), lambda i: (0, 0)),      # W_halo (constant)
            pl.BlockSpec((1, Cout), lambda i: (0, 0)),         # bias   (constant)
        ],
        out_specs=pl.BlockSpec((bm, Cout), lambda i: (i, 0)),
        compiler_params=pltpu.CompilerParams(
            dimension_semantics=("parallel",)),
    )(x2, bnd, scale, w_main, w_halo, bias2d)

    return out2.reshape(B, T_out, Cout)


# ----------------------------- pure-JAX reference --------------------------- #
def reference_forward(x, weight, bias, *, stride=4):
    B, T, Cin = x.shape
    Cout, _, K = weight.shape
    P = K // 2
    T_out = (T + 2 * P - K) // stride + 1
    xp = jnp.pad(x, ((0, 0), (P, P), (0, 0)))
    out = jnp.broadcast_to(bias, (B, T_out, Cout)).astype(jnp.float32)
    for j in range(K):
        xj = xp[:, j:j + stride * (T_out - 1) + 1:stride, :]   # (B, T_out, Cin)
        out = out + jnp.einsum("btc,oc->bto", xj, weight[:, :, j])
    return out


if __name__ == "__main__":
    # Small shapes consistent with the module's forward (defaults k=3, s=4).
    B, T, Cin, Cout = 2, 8, 32, 128
    K, STRIDE = 3, 4

    key = jax.random.PRNGKey(0)
    kx, kw, kb = jax.random.split(key, 3)
    x = jax.random.normal(kx, (B, T, Cin), jnp.float32)
    weight = 0.1 * jax.random.normal(kw, (Cout, Cin, K), jnp.float32)
    bias = 0.1 * jax.random.normal(kb, (Cout,), jnp.float32)

    T_out = (T + 2 * (K // 2) - K) // STRIDE + 1
    ref = jax.block_until_ready(reference_forward(x, weight, bias, stride=STRIDE))

    # f32 path.
    wm, wh, b2 = fold_conv1d_params(weight, bias, stride=STRIDE)   # hoisted, once
    out = jax.block_until_ready(
        temporal_downsampler(x, wm, wh, b2, kernel_size=K, stride=STRIDE))
    assert out.shape == (B, T_out, Cout), out.shape
    assert bool(jnp.all(jnp.isfinite(out)))
    assert bool(jnp.allclose(out, ref, atol=1e-3, rtol=1e-3)), \
        float(jnp.max(jnp.abs(out - ref)))

    # Multi-tile path: several row tiles, a partial last tile, mid-tile batch
    # starts and tile-boundary halos (tiny block_m purely for coverage).
    B2, T2 = 3, 24
    x_big = jax.random.normal(jax.random.PRNGKey(1), (B2, T2, Cin), jnp.float32)
    ref_big = reference_forward(x_big, weight, bias, stride=STRIDE)
    out_big = jax.block_until_ready(
        temporal_downsampler(x_big, wm, wh, b2, kernel_size=K, stride=STRIDE,
                             block_m=8))
    assert bool(jnp.allclose(out_big, ref_big, atol=1e-3, rtol=1e-3)), \
        float(jnp.max(jnp.abs(out_big - ref_big)))

    # bf16 operand path (production dtype; f32 accumulation) -- loose tolerance.
    wm16, wh16, b216 = fold_conv1d_params(weight, bias, stride=STRIDE,
                                          dtype=jnp.bfloat16)
    out16 = jax.block_until_ready(
        temporal_downsampler(x, wm16, wh16, b216, kernel_size=K, stride=STRIDE))
    assert bool(jnp.allclose(out16.astype(jnp.float32), ref, atol=0.1, rtol=0.1))

    print("KERNEL_OK")
</pallas_src>

<mosaic_0001>
module attributes {stable_mosaic.version = 11 : i64} {
  func.func @_downsample_kernel(%arg0: i32, %arg1: memref<4x128xf32, #tpu.memory_space<vmem>>, %arg2: memref<1x1x128xf32, #tpu.memory_space<vmem>>, %arg3: memref<4x1xf32, #tpu.memory_space<vmem>>, %arg4: memref<128x128xf32, #tpu.memory_space<vmem>>, %arg5: memref<128x128xf32, #tpu.memory_space<vmem>>, %arg6: memref<1x128xf32, #tpu.memory_space<vmem>>, %arg7: memref<4x128xf32, #tpu.memory_space<vmem>>) attributes {dimension_semantics = [#tpu.dimension_semantics<parallel>], iteration_bounds = array<i64: 1>, scalar_prefetch = 0 : i64, scratch_operands = 0 : i64, tpu.core_type = #tpu.core_type<tc>, window_params = [{transform_indices = @transform_0, window_bounds = array<i64: 4, 128>}, {transform_indices = @transform_1, window_bounds = array<i64: 1, 1, 128>}, {transform_indices = @transform_2, window_bounds = array<i64: 4, 1>}, {pipeline_mode = #tpu.pipeline_mode<synchronous>, transform_indices = @transform_3, window_bounds = array<i64: 128, 128>}, {pipeline_mode = #tpu.pipeline_mode<synchronous>, transform_indices = @transform_4, window_bounds = array<i64: 128, 128>}, {pipeline_mode = #tpu.pipeline_mode<synchronous>, transform_indices = @transform_5, window_bounds = array<i64: 1, 128>}, {transform_indices = @transform_6, window_bounds = array<i64: 4, 128>}]} {
    %c0 = arith.constant 0 : index
    %c0_0 = arith.constant 0 : index
    %0 = vector.load %arg1[%c0, %c0_0] : memref<4x128xf32, #tpu.memory_space<vmem>>, vector<4x128xf32>
    %c0_1 = arith.constant 0 : index
    %c0_2 = arith.constant 0 : index
    %1 = vector.load %arg4[%c0_1, %c0_2] : memref<128x128xf32, #tpu.memory_space<vmem>>, vector<128x128xf32>
    %cst = arith.constant dense<0.000000e+00> : vector<4x128xf32>
    %2 = tpu.matmul %0, %1, %cst {dimension_numbers = #tpu.dot_dimension_numbers<[1], [0], [0], [1], [0, 0, 1, 1], [], []>} : vector<4x128xf32>, vector<128x128xf32>, vector<4x128xf32> -> vector<4x128xf32>
    %c0_3 = arith.constant 0 : index
    %c0_4 = arith.constant 0 : index
    %3 = vector.load %arg5[%c0_3, %c0_4] : memref<128x128xf32, #tpu.memory_space<vmem>>, vector<128x128xf32>
    %cst_5 = arith.constant dense<0.000000e+00> : vector<4x128xf32>
    %4 = tpu.matmul %0, %3, %cst_5 {dimension_numbers = #tpu.dot_dimension_numbers<[1], [0], [0], [1], [0, 0, 1, 1], [], []>} : vector<4x128xf32>, vector<128x128xf32>, vector<4x128xf32> -> vector<4x128xf32>
    %c0_6 = arith.constant 0 : index
    %c0_7 = arith.constant 0 : index
    %c0_8 = arith.constant 0 : index
    %5 = vector.load %arg2[%c0_6, %c0_7, %c0_8] : memref<1x1x128xf32, #tpu.memory_space<vmem>>, vector<1x1x128xf32>
    %6 = vector.shape_cast %5 : vector<1x1x128xf32> to vector<1x128xf32>
    %c0_9 = arith.constant 0 : index
    %c0_10 = arith.constant 0 : index
    %7 = vector.load %arg5[%c0_9, %c0_10] : memref<128x128xf32, #tpu.memory_space<vmem>>, vector<128x128xf32>
    %cst_11 = arith.constant dense<0.000000e+00> : vector<1x128xf32>
    %8 = tpu.matmul %6, %7, %cst_11 {dimension_numbers = #tpu.dot_dimension_numbers<[1], [0], [0], [1], [0, 0, 1, 1], [], []>} : vector<1x128xf32>, vector<128x128xf32>, vector<1x128xf32> -> vector<1x128xf32>
    %9 = vector.extract_strided_slice %4 {offsets = [0, 0], sizes = [3, 128], strides = [1, 1]} : vector<4x128xf32> to vector<3x128xf32>
    %10 = tpu.concatenate %8, %9 in 0 : vector<1x128xf32>, vector<3x128xf32> -> vector<4x128xf32>
    %c0_12 = arith.constant 0 : index
    %c0_13 = arith.constant 0 : index
    %11 = vector.load %arg3[%c0_12, %c0_13] : memref<4x1xf32, #tpu.memory_space<vmem>>, vector<4x1xf32>
    %12 = vector.broadcast %11 : vector<4x1xf32> to vector<4x128xf32>
    %13 = arith.mulf %10, %12 : vector<4x128xf32>
    %14 = arith.addf %2, %13 : vector<4x128xf32>
    %c0_14 = arith.constant 0 : index
    %c0_15 = arith.constant 0 : index
    %15 = vector.load %arg6[%c0_14, %c0_15] : memref<1x128xf32, #tpu.memory_space<vmem>>, vector<1x128xf32>
    %16 = vector.broadcast %15 : vector<1x128xf32> to vector<4x128xf32>
    %17 = arith.addf %14, %16 : vector<4x128xf32>
    %c0_16 = arith.constant 0 : index
    %c0_17 = arith.constant 0 : index
    %18 = vector.load %arg7[%c0_16, %c0_17] : memref<4x128xf32, #tpu.memory_space<vmem>>, vector<4x128xf32>
    tpu.vector_store %arg7[%c0_16, %c0_17], %17 {strides = array<i32>} : memref<4x128xf32, #tpu.memory_space<vmem>>, vector<4x128xf32>,
    return
  }
  func.func @transform_0(%arg0: i32) -> (i32, i32) {
    %c0_i32 = arith.constant 0 : i32
    %c0_i32_0 = arith.constant 0 : i32
    return %arg0, %c0_i32 : i32, i32
  }
  func.func @transform_1(%arg0: i32) -> (i32, i32, i32) {
    %c0_i32 = arith.constant 0 : i32
    %c0_i32_0 = arith.constant 0 : i32
    %c0_i32_1 = arith.constant 0 : i32
    return %arg0, %c0_i32, %c0_i32_0 : i32, i32, i32
  }
  func.func @transform_2(%arg0: i32) -> (i32, i32) {
    %c0_i32 = arith.constant 0 : i32
    %c0_i32_0 = arith.constant 0 : i32
    return %arg0, %c0_i32 : i32, i32
  }
  func.func @transform_3(%arg0: i32) -> (i32, i32) {
    %c0_i32 = arith.constant 0 : i32
    %c0_i32_0 = arith.constant 0 : i32
    %c0_i32_1 = arith.constant 0 : i32
    return %c0_i32, %c0_i32_0 : i32, i32
  }
  func.func @transform_4(%arg0: i32) -> (i32, i32) {
    %c0_i32 = arith.constant 0 : i32
    %c0_i32_0 = arith.constant 0 : i32
    %c0_i32_1 = arith.constant 0 : i32
    return %c0_i32, %c0_i32_0 : i32, i32
  }
  func.func @transform_5(%arg0: i32) -> (i32, i32) {
    %c0_i32 = arith.constant 0 : i32
    %c0_i32_0 = arith.constant 0 : i32
    %c0_i32_1 = arith.constant 0 : i32
    return %c0_i32, %c0_i32_0 : i32, i32
  }
  func.func @transform_6(%arg0: i32) -> (i32, i32) {
    %c0_i32 = arith.constant 0 : i32
    %c0_i32_0 = arith.constant 0 : i32
    return %arg0, %c0_i32 : i32, i32
  }
}

</mosaic_0001>

<bundles_post_ra>
// kernel: temporal_downsampler.1
= control target key start
LH: loop header
LB: loop body
LE: loop exit
PB: predicated region body
PF: predicated region fallthrough
CT: control target
= control target key end

     0   :  { %11 = vsyncpa [#allocation3], 0  ;;  %s766_s0 = inlined_call_operand.vmem [shape: f32[4,128], index: 0, kind: input, shape index: {}]   ;;  %s767_s1 = inlined_call_operand.vmem [shape: f32[1,1,128], index: 1, kind: input, shape index: {}]   ;;  %s768_s2 = inlined_call_operand.vmem [shape: f32[4,1], index: 2, kind: input, shape index: {}]   ;;  %s769_s3 = inlined_call_operand.hbm [shape: f32[128,128], index: 3, kind: input, shape index: {}]   ;;  %s770_s4 = inlined_call_operand.hbm [shape: f32[128,128], index: 4, kind: input, shape index: {}]   ;;  %s771_s5 = inlined_call_operand.vmem [shape: f32[1,128], index: 5, kind: input, shape index: {}]   ;;  %s772_s6 = inlined_call_operand.hbm [shape: f32[4,128], index: 6, kind: output, shape index: {}]  }
   0x1   :  { %12 = vsyncpa [#allocation6], 0 }
   0x2   :  { %13 = vsyncpa [#allocation4], 0  ;;  %s644_s21 = smov [#allocation2]   ;;  %s572_s25 = scalar_lea.hbm %s769_s3, 2048 }
   0x3   :  { %s25_s22 = sshll.u32 %s644_s21, 4  ;;  %p573_p0 = scmp.ne.s32.totalorder %s769_s3, %s572_s25  ;;  %s26_s22 = int_to_ptr.vmem [resolvable:$true] %s25_s22 }
   0x4   :  { %p576_p1 = scmp.lt.u32.totalorder %s572_s25, %s769_s3 }
   0x6   :  { %p578_p2 = pnand %p576_p1, %p573_p0 }
   0x8   :  { %581 = shalt.err (!%p578_p2)
}
   0x9   :  { %s582_s30 = scalar_lea.vmem %s26_s22, 2048  ;;  %p587_p4 = scmp.lt.s32.totalorder %s26_s22, %s26_s22 }
   0xa   :  { %p583_p3 = scmp.ne.s32.totalorder %s26_s22, %s582_s30  ;;  %p588_p5 = scmp.lt.s32.totalorder %s582_s30, %s582_s30 }
   0xc   :  { %p589_p6 = por %p588_p5, %p587_p4 }
   0xe   :  { %p590_p7 = pnand %p589_p6, %p583_p3 }
  0x10   :  { %593 = shalt.err (!%p590_p7)
}
  0x11   :  { %s645_s7 = smov 128   ;;  %s646_s8 = smov 8  }
  0x12   :  { %31 = dma.hbm_to_vmem [thread:$0]  %s769_s3, 2048, %s26_s22, [#allocation3], %s645_s7, %s645_s7, %s646_s8  }
  0x13   :  { %s647_s11 = smov [#allocation5]   ;;  %s594_s15 = scalar_lea.hbm %s770_s4, 2048 }
  0x14   :  { %s37_s12 = sshll.u32 %s647_s11, 4  ;;  %p595_p8 = scmp.ne.s32.totalorder %s770_s4, %s594_s15  ;;  %s38_s12 = int_to_ptr.vmem [resolvable:$true] %s37_s12 }
  0x15   :  { %p598_p9 = scmp.lt.u32.totalorder %s594_s15, %s770_s4 }
  0x17   :  { %p600_p10 = pnand %p598_p9, %p595_p8 }
  0x19   :  { %603 = shalt.err (!%p600_p10)
}
  0x1a   :  { %s604_s20 = scalar_lea.vmem %s38_s12, 2048  ;;  %p609_p12 = scmp.lt.s32.totalorder %s38_s12, %s38_s12 }
  0x1b   :  { %p605_p11 = scmp.ne.s32.totalorder %s38_s12, %s604_s20  ;;  %p610_p13 = scmp.lt.s32.totalorder %s604_s20, %s604_s20 }
  0x1d   :  { %p611_p0 = por %p610_p13, %p609_p12 }
  0x1f   :  { %p612_p1 = pnand %p611_p0, %p605_p11 }
  0x21   :  { %615 = shalt.err (!%p612_p1)
}
  0x22   :  { %43 = dma.hbm_to_vmem [thread:$0]  %s770_s4, 2048, %s38_s12, [#allocation6], %s645_s7, %s645_s7, %s646_s8  }
  0x23   :  { %638 = dma.done.wait [#allocation3], 2048  }
  0x24   :  { %639 = vsyncadd [#allocation3], 4294965248 }
  0x25   :  { %640 = dma.done.wait [#allocation6], 2048  }
  0x26   :  { %641 = vsyncadd [#allocation6], 4294965248  ;;  %v648_v0 = vmov 0.0|0.0   ;;  %vm649_vm0 = vmmov 0   ;;  %v650_v1 = vmov 0.0   ;;  %v651_v2 = vmov 0  }
  0x27   :  { %490 = vmatprep.subr.bf16.mxu0 %v648_v0  ;;  %514 = vmatprep.subr.bf16.mxu1 %v648_v0  ;;  %v69_v3 = vld [vmem:[#allocation5] sm:$0xff]  ;;  %v70_v4 = vld [vmem:[#allocation5 + $0x8] sm:$0xff]  ;;  %v71_v5 = vld [vmem:[#allocation5 + $0x10] sm:$0xff]  ;;  %vm229_vm1 = vcmask 1040384   ;;  %s652_s26 = smov [#allocation7]  }
  0x28   :  { %417 = vmatprep.mubr.msk.f32.mxu0 %vm649_vm0, %v650_v1  ;;  %452 = vmatprep.mubr.msk.f32.mxu1 %vm649_vm0, %v650_v1  ;;  %v491_v6 = vpack.c.bf16 %v70_v4, %v69_v3  ;;  %v72_v7 = vld [vmem:[#allocation5 + $0x18] sm:$0xff]  ;;  %v73_v9 = vld [vmem:[#allocation5 + $0x20] sm:$0xff]  ;;  %v74_v10 = vld [vmem:[#allocation5 + $0x28] sm:$0xff]  ;;  %s323_s27 = sshll.u32 %s652_s26, 4  ;;  %s324_s27 = int_to_ptr.vmem [resolvable:$true] %s323_s27 }
  0x29   :  { %571 = vset.pattern.permute.xlu0 %v651_v2  ;;  %v494_v8 = vpack.c.bf16 %v72_v7, %v71_v5  ;;  %v497_v11 = vpack.c.bf16 %v74_v10, %v73_v9  ;;  %v75_v12 = vld [vmem:[#allocation5 + $0x30] sm:$0xff]  ;;  %v76_v13 = vld [vmem:[#allocation5 + $0x38] sm:$0xff]  ;;  %v231_v15 = vld [vmem:[%s768_s2] sm:$0xf]  ;;  %s616_s28 = scalar_lea.vmem %s324_s27, 64  ;;  %p621_p3 = scmp.lt.s32.totalorder %s324_s27, %s324_s27 }
  0x2a   :  { %492 = vmatpush3.bf16.msra.mxu0 %v491_v6  ;;  %516 = vmatpush3.bf16.msra.mxu1 %v491_v6  ;;  %v500_v14 = vpack.c.bf16 %v76_v13, %v75_v12  ;;  %v77_v16 = vld [vmem:[#allocation5 + $0x40] sm:$0xff]  ;;  %v78_v17 = vld [vmem:[#allocation5 + $0x48] sm:$0xff]  ;;  %v79_v19 = vld [vmem:[#allocation5 + $0x50] sm:$0xff]  ;;  %p617_p2 = scmp.ne.s32.totalorder %s324_s27, %s616_s28  ;;  %p622_p4 = scmp.lt.s32.totalorder %s616_s28, %s616_s28 }
  0x2b   :  { %493 = vmatprep.subr.bf16.mxu0 %v648_v0  ;;  %517 = vmatprep.subr.bf16.mxu1 %v648_v0  ;;  %v503_v18 = vpack.c.bf16 %v78_v17, %v77_v16  ;;  %v80_v20 = vld [vmem:[#allocation5 + $0x58] sm:$0xff]  ;;  %v81_v22 = vld [vmem:[#allocation5 + $0x60] sm:$0xff]  ;;  %v82_v23 = vld [vmem:[#allocation5 + $0x68] sm:$0xff] }
  0x2c   :  { %234 = vperm.xlu0 %571, %v231_v15   ;;  %v506_v21 = vpack.c.bf16 %v80_v20, %v79_v19  ;;  %v509_v24 = vpack.c.bf16 %v82_v23, %v81_v22  ;;  %v83_v25 = vld [vmem:[#allocation5 + $0x70] sm:$0xff]  ;;  %v84_v26 = vld [vmem:[#allocation5 + $0x78] sm:$0xff]  ;;  %v53_v28 = vld [vmem:[#allocation2] sm:$0xff]  ;;  %p623_p5 = por %p622_p4, %p621_p3 }
  0x2d   :  { %v512_v27 = vpack.c.bf16 %v84_v26, %v83_v25  ;;  %v54_v29 = vld [vmem:[#allocation2 + $0x8] sm:$0xff]  ;;  %v52_v30 = vld [vmem:[%s766_s0] sm:$0xf]  ;;  %v55_v33 = vld [vmem:[#allocation2 + $0x10] sm:$0xff] }
  0x2e   :  { %495 = vmatpush3.bf16.msra.mxu0 %v494_v8  ;;  %519 = vmatpush3.bf16.msra.mxu1 %v494_v8  ;;  %v539_v31 = vpack.c.bf16 %v54_v29, %v53_v28  ;;  %v155_v32 = vld [vmem:[%s767_s1] sm:$0x1]  ;;  %v56_v34 = vld [vmem:[#allocation2 + $0x18] sm:$0xff]  ;;  %v58_v37 = vld [vmem:[#allocation2 + $0x28] sm:$0xff]  ;;  %p624_p6 = pnand %p623_p5, %p617_p2 }
  0x2f   :  { %496 = vmatprep.subr.bf16.mxu0 %v648_v0  ;;  %520 = vmatprep.subr.bf16.mxu1 %v648_v0  ;;  %v542_v35 = vpack.c.bf16 %v56_v34, %v55_v33  ;;  %v57_v36 = vld [vmem:[#allocation2 + $0x20] sm:$0xff]  ;;  %v59_v39 = vld [vmem:[#allocation2 + $0x30] sm:$0xff]  ;;  %v60_v40 = vld [vmem:[#allocation2 + $0x38] sm:$0xff] }
  0x30   :  { %v545_v38 = vpack.c.bf16 %v58_v37, %v57_v36  ;;  %v548_v41 = vpack.c.bf16 %v60_v40, %v59_v39  ;;  %v61_v42 = vld [vmem:[#allocation2 + $0x40] sm:$0xff]  ;;  %v62_v43 = vld [vmem:[#allocation2 + $0x48] sm:$0xff]  ;;  %v63_v45 = vld [vmem:[#allocation2 + $0x50] sm:$0xff] }
  0x31   :  { %v551_v44 = vpack.c.bf16 %v62_v43, %v61_v42  ;;  %v64_v46 = vld [vmem:[#allocation2 + $0x58] sm:$0xff]  ;;  %v65_v48 = vld [vmem:[#allocation2 + $0x60] sm:$0xff]  ;;  %v66_v49 = vld [vmem:[#allocation2 + $0x68] sm:$0xff] }
  0x32   :  { %498 = vmatpush3.bf16.msra.mxu0 %v497_v11  ;;  %522 = vmatpush3.bf16.msra.mxu1 %v497_v11  ;;  %v554_v47 = vpack.c.bf16 %v64_v46, %v63_v45  ;;  %v557_v50 = vpack.c.bf16 %v66_v49, %v65_v48  ;;  %v67_v51 = vld [vmem:[#allocation2 + $0x70] sm:$0xff]  ;;  %v68_v52 = vld [vmem:[#allocation2 + $0x78] sm:$0xff]  ;;  %v333_v63 = vld [vmem:[%s771_s5] ss:$0 sm:$0xff] }
  0x33   :  { %499 = vmatprep.subr.bf16.mxu0 %v648_v0  ;;  %523 = vmatprep.subr.bf16.mxu1 %v648_v0  ;;  %v560_v53 = vpack.c.bf16 %v68_v52, %v67_v51 }
  0x36   :  { %501 = vmatpush3.bf16.msra.mxu0 %v500_v14  ;;  %525 = vmatpush3.bf16.msra.mxu1 %v500_v14 }
  0x37   :  { %502 = vmatprep.subr.bf16.mxu0 %v648_v0  ;;  %526 = vmatprep.subr.bf16.mxu1 %v648_v0 }
  0x3a   :  { %504 = vmatpush3.bf16.msra.mxu0 %v503_v18  ;;  %528 = vmatpush3.bf16.msra.mxu1 %v503_v18 }
  0x3b   :  { %505 = vmatprep.subr.bf16.mxu0 %v648_v0  ;;  %529 = vmatprep.subr.bf16.mxu1 %v648_v0 }
  0x3e   :  { %507 = vmatpush3.bf16.msra.mxu0 %v506_v21  ;;  %531 = vmatpush3.bf16.msra.mxu1 %v506_v21 }
  0x3f   :  { %508 = vmatprep.subr.bf16.mxu0 %v648_v0  ;;  %532 = vmatprep.subr.bf16.mxu1 %v648_v0 }
  0x42   :  { %510 = vmatpush3.bf16.msra.mxu0 %v509_v24  ;;  %534 = vmatpush3.bf16.msra.mxu1 %v509_v24 }
  0x43   :  { %511 = vmatprep.subr.bf16.mxu0 %v648_v0  ;;  %535 = vmatprep.subr.bf16.mxu1 %v648_v0 }
  0x46   :  { %513 = vmatpush3.bf16.msra.mxu0 %v512_v27  ;;  %537 = vmatpush3.bf16.msra.mxu1 %v512_v27 }
  0x47   :  { %538 = vmatprep.subr.bf16.mxu0 %v648_v0 }
  0x49   :  { %418 = vmatmul.mubr.f32.vlgmr.msra.gmra.mrb[0].mxu0 %v52_v30  ;;  %453 = vmatmul.mubr.f32.vlgmr.msra.gmra.mrb[0].mxu1 %v155_v32 }
  0x4a   :  { %540 = vmatpush3.bf16.msra.mxu0 %v539_v31  ;;  %487 = vmatprep.mubr.msk.f32.mxu0 %vm649_vm0, %v650_v1 }
  0x4b   :  { %541 = vmatprep.subr.bf16.mxu0 %v648_v0 }
  0x4e   :  { %543 = vmatpush3.bf16.msra.mxu0 %v542_v35 }
  0x4f   :  { %544 = vmatprep.subr.bf16.mxu0 %v648_v0 }
  0x52   :  { %546 = vmatpush3.bf16.msra.mxu0 %v545_v38 }
  0x53   :  { %547 = vmatprep.subr.bf16.mxu0 %v648_v0 }
  0x56   :  { %549 = vmatpush3.bf16.msra.mxu0 %v548_v41 }
  0x57   :  { %550 = vmatprep.subr.bf16.mxu0 %v648_v0 }
  0x5a   :  { %552 = vmatpush3.bf16.msra.mxu0 %v551_v44 }
  0x5b   :  { %553 = vmatprep.subr.bf16.mxu0 %v648_v0 }
  0x5e   :  { %555 = vmatpush3.bf16.msra.mxu0 %v554_v47 }
  0x5f   :  { %556 = vmatprep.subr.bf16.mxu0 %v648_v0 }
  0x62   :  { %558 = vmatpush3.bf16.msra.mxu0 %v557_v50 }
  0x63   :  { %559 = vmatprep.subr.bf16.mxu0 %v648_v0 }
  0x66   :  { %561 = vmatpush3.bf16.msra.mxu0 %v560_v53 }
  0x69   :  { %488 = vmatmul.mubr.f32.vlgmr.msra.gmra.mrb[2].mxu0 %v52_v30 }
  0xab   :  { %v235_v60 = vpop.permute.xlu0 %234 }
 0x11c   :  { %v151_v54 = vpop.f32.mrb[0].mxu0  ;;  %v222_v55 = vpop.f32.mrb[0].mxu1 }
 0x11d   :  { %v227_v56 = vrot.slane %v151_v54, 7  ;;  %v419_v57 = vpop.f32.mrb[1].mxu0  ;;  %v454_v58 = vpop.f32.mrb[1].mxu1 }
 0x11f   :  { %v230_v59 = vsel %vm229_vm1, %v222_v55, %v227_v56 }
 0x120   :  { %v237_v61 = vmul.f32 %v235_v60, %v230_v59 }
 0x13c   :  { %v304_v62 = vpop.f32.mrb[2].mxu0 }
 0x13d   :  { %v305_v1 = vadd.f32 %v304_v62, %v237_v61  ;;  %v489_v0 = vpop.f32.mrb[3].mxu0 }
 0x13f   :  { %v315_v2 = vadd.f32 %v333_v63, %v305_v1 }
 0x141   :  { %316 = vst [vmem:[#allocation7] sm:$0xf] %v315_v2 }
 0x142   :  { %627 = shalt.err (!%p624_p6)
}
 0x143   :  { %s628_s7 = scalar_lea.hbm %s772_s6, 64 }
 0x144   :  { %p629_p7 = scmp.ne.s32.totalorder %s772_s6, %s628_s7  ;;  %p632_p8 = scmp.lt.u32.totalorder %s628_s7, %s772_s6 }
 0x146   :  { %p634_p9 = pnand %p632_p8, %p629_p7 }
 0x148   :  { %637 = shalt.err (!%p634_p9)
}
 0x149   :  { %326 = dma.vmem_to_hbm [thread:$0]  %s324_s27, 64, %s772_s6, [#allocation4]  }
 0x14a   :  { %642 = dma.done.wait [#allocation4], 64  }
 0x14b   :  { %643 = vsyncadd [#allocation4], 4294967232 }
 0x14c   :  { %330 = vsyncpa [#allocation3], 1 }
 0x14d   :  { %331 = vsyncpa [#allocation6], 1 }
 0x14e   :  { %332 = vsyncpa [#allocation4], 1 }

</bundles_post_ra>
